<compile_context>
chip_gen: v5e
topology: v5e:2x2
jax: 0.10.0
libtpu: 0.0.40
codegen_flags: <defaults>
</compile_context>

<pallas_src>
import functools
import math

import jax
import jax.numpy as jnp
from jax.experimental import pallas as pl
from jax.experimental.pallas import tpu as pltpu


def _round_up(n, m):
    return ((n + m - 1) // m) * m


def _device_kind():
    try:
        return jax.devices()[0].device_kind.lower()
    except Exception:
        return ""


def _num_tensorcores():
    # v7x packs 2 TensorCores per chip; v5e / v6e expose 1.
    return 2 if "v7" in _device_kind() else 1


def _supports_bf16_eup():
    # bf16 VPU/EUP paths exist on v6e / v7x; v5e (and older) are f32-only.
    kind = _device_kind()
    return ("v6" in kind) or ("v7" in kind)


def _resident_spec(shape, index_map):
    """BlockSpec for a grid-invariant operand: single-buffered when supported
    (double-buffering a constant block only doubles its VMEM footprint)."""
    if hasattr(pl, "Buffered"):
        try:
            return pl.BlockSpec(shape, index_map, pipeline_mode=pl.Buffered(1))
        except TypeError:
            pass
    return pl.BlockSpec(shape, index_map)


def _gabor_kernel(x_ref, w_ref, b_ref, o_ref, *, out_p, tail_dtype):
    # x_ref: (tm, in_features)            input rows (caller dtype)
    # w_ref: (in_features, 2 * out_p)     fused [omega_0*Wf | sigma0*Ws] (pre-transposed)
    # b_ref: (1, 2 * out_p)               fused [omega_0*bf | sigma0*bs], f32
    # o_ref: (tm, out_p)                  lane-dense output tile
    x = x_ref[...]

    # One fused MXU matmul, f32 accumulation; bias add stays in f32.
    y = jnp.dot(x, w_ref[...], preferred_element_type=jnp.float32) + b_ref[...]

    # Split at a 128-multiple lane boundary (vreg-aligned; out_p % 128 == 0).
    omega = y[:, :out_p].astype(tail_dtype)   # = omega_0 * freqs(x)
    s = y[:, out_p:].astype(tail_dtype)       # = sigma0  * scale(x)

    # Gabor nonlinearity.  tail_dtype is bf16 on v6e/v7x when the output is
    # bf16 (bf16 EUP/VPU ~2x the binding-slot throughput), f32 otherwise.
    o_ref[...] = (jnp.cos(omega) * jnp.exp(-(s * s))).astype(o_ref.dtype)


def prepare_real_gabor_params(w_freqs, b_freqs, w_scale, b_scale, *,
                              omega_0=10.0, sigma0=10.0, param_dtype=None):
    """One-time prep of PyTorch-style params (weights (out,in), biases (out,))
    into the fused, pre-transposed, pre-scaled, lane-padded form the kernel
    consumes.  Call once at parameter-creation time with `param_dtype` set to
    the serving activation dtype so the hot path never re-casts the weight."""
    out_features, in_features = w_freqs.shape
    assert w_scale.shape == (out_features, in_features)
    if param_dtype is None:
        param_dtype = jnp.float32

    out_p = max(128, _round_up(out_features, 128))  # lane-dense output width
    pad = out_p - out_features

    # Constant-fold omega_0 / sigma0 into weights & biases (f32 fold, then
    # cast to the serving dtype).
    wf = jnp.asarray(w_freqs, jnp.float32) * float(omega_0)
    ws = jnp.asarray(w_scale, jnp.float32) * float(sigma0)
    bf = jnp.asarray(b_freqs, jnp.float32) * float(omega_0)
    bs = jnp.asarray(b_scale, jnp.float32) * float(sigma0)

    wf_t = jnp.pad(wf.T, ((0, 0), (0, pad)))            # (in, out_p)
    ws_t = jnp.pad(ws.T, ((0, 0), (0, pad)))            # (in, out_p)
    w_fused = jnp.concatenate([wf_t, ws_t], axis=1).astype(param_dtype)  # (in, 2*out_p)

    b_fused = jnp.concatenate([jnp.pad(bf, (0, pad)), jnp.pad(bs, (0, pad))])
    b_fused = b_fused.reshape(1, 2 * out_p).astype(jnp.float32)  # bias stays f32
    return w_fused, b_fused, out_features


def real_gabor_apply(x, w_fused, b_fused, out_features):
    """x: (..., in_features) -> (..., out_features), dtype follows x."""
    orig_shape = x.shape
    in_features = orig_shape[-1]
    two_out_p = w_fused.shape[1]
    out_p = two_out_p // 2
    assert w_fused.shape[0] == in_features

    # Hot path assumes params were prepared in the serving dtype; fall back to
    # a cast only if the caller didn't (extra HBM pass -- avoid in production).
    if w_fused.dtype != x.dtype:
        w_fused = w_fused.astype(x.dtype)

    xm = x.reshape(-1, in_features)
    M = xm.shape[0]

    itemsize = jnp.dtype(x.dtype).itemsize
    sub = max(8, 32 // itemsize)          # sublane packing: 8 f32 / 16 bf16 / 32 int8
    cores = _num_tensorcores()

    # Row tiling: big tiles amortize per-grid-step overhead; no row padding
    # (Pallas clips the ragged last block).  On 2-TC chips make sure there are
    # >= 2 grid steps so "parallel" shards rows across both TensorCores.
    tm = 512
    if M <= tm * cores:
        tm = max(sub, _round_up(pl.cdiv(M, cores), sub))
    grid = (pl.cdiv(M, tm),)

    # Transcendental tail dtype: bf16 where the hardware has bf16 EUP/VPU and
    # the output is bf16 anyway; f32 otherwise (v5e, or f32 callers).
    tail_dtype = (jnp.bfloat16
                  if (x.dtype == jnp.bfloat16 and _supports_bf16_eup())
                  else jnp.float32)

    # Scoped-VMEM budget from the actual footprint (double-buffered x/out,
    # single-buffered resident W/bias, f32 intermediate), with 2x headroom.
    w_bytes = in_features * two_out_p * jnp.dtype(w_fused.dtype).itemsize
    x_tile_bytes = tm * in_features * itemsize
    o_tile_bytes = tm * out_p * itemsize
    y_bytes = tm * two_out_p * 4
    needed = 2 * x_tile_bytes + 2 * o_tile_bytes + w_bytes + two_out_p * 4 + y_bytes
    vmem_limit = int(min(100 * 1024 * 1024, max(2 * needed, 32 * 1024 * 1024)))

    kernel = functools.partial(_gabor_kernel, out_p=out_p, tail_dtype=tail_dtype)

    out = pl.pallas_call(
        kernel,
        out_shape=jax.ShapeDtypeStruct((M, out_p), x.dtype),
        grid_spec=pltpu.PrefetchScalarGridSpec(
            num_scalar_prefetch=0,
            grid=grid,
            in_specs=[
                pl.BlockSpec((tm, in_features), lambda i: (i, 0)),           # x rows
                _resident_spec((in_features, two_out_p), lambda i: (0, 0)),  # fused W (resident)
                _resident_spec((1, two_out_p), lambda i: (0, 0)),            # fused bias
            ],
            out_specs=pl.BlockSpec((tm, out_p), lambda i: (i, 0)),
        ),
        compiler_params=pltpu.CompilerParams(
            dimension_semantics=("parallel",),   # shards row tiles across v7x's 2 TCs
            vmem_limit_bytes=vmem_limit,
        ),
    )(xm, w_fused, b_fused)

    # Strip lane padding and restore the leading shape.
    return out[:, :out_features].reshape(*orig_shape[:-1], out_features)


def real_gabor_layer(x, w_freqs, b_freqs, w_scale, b_scale, *,
                     omega_0=10.0, sigma0=10.0):
    """Convenience one-shot API (prep + apply).  For repeated inference, call
    prepare_real_gabor_params once (in the serving dtype) and reuse."""
    w_fused, b_fused, out_features = prepare_real_gabor_params(
        w_freqs, b_freqs, w_scale, b_scale,
        omega_0=omega_0, sigma0=sigma0, param_dtype=x.dtype)
    return real_gabor_apply(x, w_fused, b_fused, out_features)


def _init_linear_params(key, in_features, out_features):
    # Mimics torch.nn.Linear default init: U(-1/sqrt(in), 1/sqrt(in))
    kw, kb = jax.random.split(key)
    bound = 1.0 / math.sqrt(in_features)
    w = jax.random.uniform(kw, (out_features, in_features), jnp.float32, -bound, bound)
    b = jax.random.uniform(kb, (out_features,), jnp.float32, -bound, bound)
    return w, b


if __name__ == "__main__":
    key = jax.random.PRNGKey(0)
    k_x, k_f, k_s = jax.random.split(key, 3)

    batch, seq, in_features, out_features = 2, 8, 32, 64
    omega_0, sigma0 = 10.0, 10.0

    x = jax.random.normal(k_x, (batch, seq, in_features), jnp.float32)
    w_freqs, b_freqs = _init_linear_params(k_f, in_features, out_features)
    w_scale, b_scale = _init_linear_params(k_s, in_features, out_features)

    # One-time parameter prep (fuse / transpose / fold constants / lane-pad)
    # in the serving dtype, then the hot-path apply.
    w_fused, b_fused, out_f = prepare_real_gabor_params(
        w_freqs, b_freqs, w_scale, b_scale,
        omega_0=omega_0, sigma0=sigma0, param_dtype=x.dtype)
    out = real_gabor_apply(x, w_fused, b_fused, out_f)
    out = jax.block_until_ready(out)

    # Pure-JAX reference (matches the PyTorch module exactly).
    freqs_ref = x @ w_freqs.T + b_freqs
    scale_ref = x @ w_scale.T + b_scale
    ref = jnp.cos(omega_0 * freqs_ref) * jnp.exp(-(sigma0 * scale_ref) ** 2)

    assert out.shape == (batch, seq, out_features)
    assert out.dtype == x.dtype
    # Folding omega_0/sigma0 into W/b reassociates FP ops; cos() amplifies
    # that by |omega| ~ O(10), so compare at 1e-4 (observed error well below).
    assert jnp.allclose(out, ref, atol=1e-4, rtol=1e-4), \
        float(jnp.max(jnp.abs(out - ref)))

    # bf16 smoke run: exercises the bf16 transcendental tail (v6e/v7x) and the
    # bf16 sublane-packed row tiling; numerics are bf16-grade (phase error
    # ~2^-8 * |omega|), so only shape/dtype/finiteness are asserted here.
    xb = x.astype(jnp.bfloat16)
    wb, bb, out_fb = prepare_real_gabor_params(
        w_freqs, b_freqs, w_scale, b_scale,
        omega_0=omega_0, sigma0=sigma0, param_dtype=jnp.bfloat16)
    out_b = jax.block_until_ready(real_gabor_apply(xb, wb, bb, out_fb))
    assert out_b.shape == (batch, seq, out_features)
    assert out_b.dtype == jnp.bfloat16
    assert bool(jnp.all(jnp.isfinite(out_b.astype(jnp.float32))))

    print("KERNEL_OK")
</pallas_src>

<mosaic_0001>
module attributes {stable_mosaic.version = 11 : i64} {
  func.func @_gabor_kernel(%arg0: i32, %arg1: memref<16x32xf32, #tpu.memory_space<vmem>>, %arg2: memref<32x256xf32, #tpu.memory_space<vmem>>, %arg3: memref<1x256xf32, #tpu.memory_space<vmem>>, %arg4: memref<16x128xf32, #tpu.memory_space<vmem>>) attributes {dimension_semantics = [#tpu.dimension_semantics<parallel>], iteration_bounds = array<i64: 1>, scalar_prefetch = 0 : i64, scratch_operands = 0 : i64, tpu.core_type = #tpu.core_type<tc>, window_params = [{transform_indices = @transform_0, window_bounds = array<i64: 16, 32>}, {pipeline_mode = #tpu.pipeline_mode<synchronous>, transform_indices = @transform_1, window_bounds = array<i64: 32, 256>}, {pipeline_mode = #tpu.pipeline_mode<synchronous>, transform_indices = @transform_2, window_bounds = array<i64: 1, 256>}, {transform_indices = @transform_3, window_bounds = array<i64: 16, 128>}]} {
    %c0 = arith.constant 0 : index
    %c0_0 = arith.constant 0 : index
    %0 = vector.load %arg1[%c0, %c0_0] : memref<16x32xf32, #tpu.memory_space<vmem>>, vector<16x32xf32>
    %c0_1 = arith.constant 0 : index
    %c0_2 = arith.constant 0 : index
    %1 = vector.load %arg2[%c0_1, %c0_2] : memref<32x256xf32, #tpu.memory_space<vmem>>, vector<32x256xf32>
    %cst = arith.constant dense<0.000000e+00> : vector<16x256xf32>
    %2 = tpu.matmul %0, %1, %cst {dimension_numbers = #tpu.dot_dimension_numbers<[1], [0], [0], [1], [0, 0, 1, 1], [], []>} : vector<16x32xf32>, vector<32x256xf32>, vector<16x256xf32> -> vector<16x256xf32>
    %c0_3 = arith.constant 0 : index
    %c0_4 = arith.constant 0 : index
    %3 = vector.load %arg3[%c0_3, %c0_4] : memref<1x256xf32, #tpu.memory_space<vmem>>, vector<1x256xf32>
    %4 = vector.broadcast %3 : vector<1x256xf32> to vector<16x256xf32>
    %5 = arith.addf %2, %4 : vector<16x256xf32>
    %6 = vector.extract_strided_slice %5 {offsets = [0, 0], sizes = [16, 128], strides = [1, 1]} : vector<16x256xf32> to vector<16x128xf32>
    %7 = vector.extract_strided_slice %5 {offsets = [0, 128], sizes = [16, 128], strides = [1, 1]} : vector<16x256xf32> to vector<16x128xf32>
    %8 = math.cos %6 : vector<16x128xf32>
    %9 = arith.mulf %7, %7 : vector<16x128xf32>
    %cst_5 = arith.constant 0.000000e+00 : f32
    %10 = vector.broadcast %cst_5 : f32 to vector<16x128xf32>
    %11 = arith.subf %10, %9 : vector<16x128xf32>
    %12 = math.exp %11 : vector<16x128xf32>
    %13 = arith.mulf %8, %12 : vector<16x128xf32>
    %c0_6 = arith.constant 0 : index
    %c0_7 = arith.constant 0 : index
    %14 = vector.load %arg4[%c0_6, %c0_7] : memref<16x128xf32, #tpu.memory_space<vmem>>, vector<16x128xf32>
    tpu.vector_store %arg4[%c0_6, %c0_7], %13 {strides = array<i32>} : memref<16x128xf32, #tpu.memory_space<vmem>>, vector<16x128xf32>,
    return
  }
  func.func @transform_0(%arg0: i32) -> (i32, i32) {
    %c0_i32 = arith.constant 0 : i32
    %c0_i32_0 = arith.constant 0 : i32
    return %arg0, %c0_i32 : i32, i32
  }
  func.func @transform_1(%arg0: i32) -> (i32, i32) {
    %c0_i32 = arith.constant 0 : i32
    %c0_i32_0 = arith.constant 0 : i32
    %c0_i32_1 = arith.constant 0 : i32
    return %c0_i32, %c0_i32_0 : i32, i32
  }
  func.func @transform_2(%arg0: i32) -> (i32, i32) {
    %c0_i32 = arith.constant 0 : i32
    %c0_i32_0 = arith.constant 0 : i32
    %c0_i32_1 = arith.constant 0 : i32
    return %c0_i32, %c0_i32_0 : i32, i32
  }
  func.func @transform_3(%arg0: i32) -> (i32, i32) {
    %c0_i32 = arith.constant 0 : i32
    %c0_i32_0 = arith.constant 0 : i32
    return %arg0, %c0_i32 : i32, i32
  }
}

</mosaic_0001>

<bundles_post_ra>
// kernel: tpu_custom_call.1
= control target key start
LH: loop header
LB: loop body
LE: loop exit
PB: predicated region body
PF: predicated region fallthrough
CT: control target
= control target key end

     0   :  { %8 = vsyncpa [#allocation3], 0  ;;  %s825_s0 = inlined_call_operand.hbm [shape: f32[16,32], index: 0, kind: input, shape index: {}]   ;;  %s826_s1 = inlined_call_operand.hbm [shape: f32[32,256], index: 1, kind: input, shape index: {}]   ;;  %s827_s2 = inlined_call_operand.hbm [shape: f32[1,256], index: 2, kind: input, shape index: {}]   ;;  %s828_s3 = inlined_call_operand.hbm [shape: f32[16,128], index: 3, kind: output, shape index: {}]  }
   0x1   :  { %9 = vsyncpa [#allocation6], 0  ;;  %s28_s14 = sshll.u32 %s826_s1, 4  ;;  %s29_s14 = int_to_ptr.hbm [resolvable:$true] %s28_s14 }
   0x2   :  { %10 = vsyncpa [#allocation4], 0  ;;  %s608_s15 = smov [#allocation5]   ;;  %s15_s19 = sshll.u32 %s825_s0, 4  ;;  %s16_s19 = int_to_ptr.hbm [resolvable:$true] %s15_s19 }
   0x3   :  { %s30_s16 = sshll.u32 %s608_s15, 4  ;;  %s609_s20 = smov 256   ;;  %s31_s16 = int_to_ptr.vmem [resolvable:$true] %s30_s16 }
   0x4   :  { %s610_s21 = smov 16   ;;  %s611_s22 = smov [#allocation2]  }
   0x5   :  { %36 = dma.hbm_to_vmem [thread:$0]  %s29_s14, 1024, %s31_s16, [#allocation6], %s609_s20, %s609_s20, %s610_s21  }
   0x6   :  { %s17_s23 = sshll.u32 %s611_s22, 4  ;;  %s612_s24 = smov 128   ;;  %s18_s23 = int_to_ptr.vmem [resolvable:$true] %s17_s23 }
   0x7   :  { %s613_s25 = smov 8   ;;  %s42_s27 = sshll.u32 %s827_s2, 4  ;;  %s43_s27 = int_to_ptr.hbm [resolvable:$true] %s42_s27 }
   0x8   :  { %23 = dma.hbm_to_vmem [thread:$0]  %s16_s19, 256, %s18_s23, [#allocation3], %s612_s24, %s612_s24, %s613_s25  }
   0x9   :  { %s614_s28 = smov [#allocation7]  }
   0xa   :  { %s44_s0 = sshll.u32 %s614_s28, 4  ;;  %s45_s0 = int_to_ptr.vmem [resolvable:$true] %s44_s0 }
   0xb   :  { %47 = dma.hbm_to_vmem [thread:$0]  %s43_s27, 32, %s45_s0, [#allocation6]  }
   0xc   :  { %602 = dma.done.wait [#allocation3], 256  }
   0xd   :  { %603 = vsyncadd [#allocation3], 4294967040 }
   0xe   :  { %604 = dma.done.wait [#allocation6], 1056  }
   0xf   :  { %605 = vsyncadd [#allocation6], 4294966240  ;;  %v68_v0 = vld [vmem:[#allocation5 + $0x30] sm:$0xff]  ;;  %v66_v1 = vld [vmem:[#allocation5 + $0x20] sm:$0xff]  ;;  %vm76_vm0 = vcmask 261120   ;;  %s622_s2 = smov [#allocation8]  }
  0x10   :  { %95 = vmatpush.msra.mxu0 %v68_v0  ;;  %479 = vmatpush.msra.mxu2 %v68_v0  ;;  %v64_v2 = vld [vmem:[#allocation5 + $0x10] sm:$0xff]  ;;  %v69_v3 = vld [vmem:[#allocation5 + $0x38] sm:$0xff]  ;;  %v67_v4 = vld [vmem:[#allocation5 + $0x28] sm:$0xff]  ;;  %v615_v31 = vmov 683565275   ;;  %s453_s29 = sshll.u32 %s622_s2, 4  ;;  %s454_s29 = int_to_ptr.vmem [resolvable:$true] %s453_s29 }
  0x11   :  { %v62_v5 = vld [vmem:[#allocation5] sm:$0xff]  ;;  %118 = vmatpush.msra.mxu1 %v69_v3  ;;  %483 = vmatpush.msra.mxu3 %v69_v3  ;;  %v60_v6 = vld [vmem:[#allocation2] sm:$0xff]  ;;  %v61_v7 = vld [vmem:[#allocation2 + $0x8] sm:$0xff]  ;;  %v616_v33 = vmov 2475754826   ;;  %s455_s5 = sshll.u32 %s828_s3, 4  ;;  %s456_s5 = int_to_ptr.hbm [resolvable:$true] %s455_s5 }
  0x12   :  { %96 = vmatpush.msra.mxu0 %v66_v1  ;;  %480 = vmatpush.msra.mxu2 %v66_v1  ;;  %v65_v8 = vld [vmem:[#allocation5 + $0x18] sm:$0xff]  ;;  %v63_v9 = vld [vmem:[#allocation5 + $0x8] sm:$0xff]  ;;  %v655_v10 = vld [vmem:[#allocation7] sm:$0x3]  ;;  %v617_v35 = vmov 2131351028  }
  0x13   :  { %119 = vmatpush.msra.mxu1 %v67_v4  ;;  %484 = vmatpush.msra.mxu3 %v67_v4  ;;  %v72_v11 = vperm.slane %v655_v10, 0  ;;  %v618_v37 = vmov 2102212464   ;;  %v619_v39 = vmov 920167782  }
  0x14   :  { %97 = vmatpush.msra.mxu0 %v64_v2  ;;  %481 = vmatpush.msra.mxu2 %v64_v2  ;;  %v620_v48 = vmov 1326507024  }
  0x15   :  { %120 = vmatpush.msra.mxu1 %v65_v8  ;;  %485 = vmatpush.msra.mxu3 %v65_v8 }
  0x16   :  { %98 = vmatpush.msra.mxu0 %v62_v5  ;;  %482 = vmatpush.msra.mxu2 %v62_v5 }
  0x17   :  { %469 = vmatmul.msk.f32.vlgmr.msra.gmra.mxu0 %vm76_vm0, %v60_v6  ;;  %470 = vmatmul.msk.f32.vlgmr.msra.gmra.mxu2 %vm76_vm0, %v61_v7 }
  0x18   :  { %121 = vmatpush.msra.mxu1 %v63_v9  ;;  %486 = vmatpush.msra.mxu3 %v63_v9 }
  0x19   :  { %471 = vmatmul.msk.f32.vlgmr.msra.gmra.mxu1 %vm76_vm0, %v60_v6  ;;  %472 = vmatmul.msk.f32.vlgmr.msra.gmra.mxu3 %vm76_vm0, %v61_v7 }
  0x94   :  { %v100_v12 = vpop.f32.mrf.mxu0 }
  0x95   :  { %v658_v13 = vadd.f32 %v100_v12, %v72_v11 }
  0x97   :  { %v132_v14 = vand.u32 2139095040, %v658_v13  ;;  %v129_v15 = vand.u32 2147483647, %v658_v13 }
  0x99   :  { %v133_v16 = vshrl.u32 %v132_v14, 23  ;;  %v136_v20 = vand.u32 8388607, %v129_v15 }
  0x9a   :  { %v103_v17 = vpop.f32.mrf.mxu2 }
  0x9b   :  { %v473_v18 = vadd.s32 4294967169, %v133_v16  ;;  %v662_v19 = vadd.f32 %v103_v17, %v72_v11  ;;  %v137_v23 = vor.u32 8388608, %v136_v20 }
  0x9d   :  { %v139_v21 = vadd.s32 1, %v473_v18  ;;  %v286_v22 = vand.u32 2139095040, %v662_v19  ;;  %v283_v25 = vand.u32 2147483647, %v662_v19  ;;  %v673_v41 = vshll.u32 %v137_v23, 8 }
  0x9f   :  { %vm140_vm1 = vcmp.gt.s32.totalorder %v139_v21, 0  ;;  %v287_v26 = vshrl.u32 %v286_v22, 23  ;;  %v290_v42 = vand.u32 8388607, %v283_v25  ;;  %v178_v56 = vand.u32 65535, %v673_v41 }
  0xa0   :  { %v141_v24 = vsel %vm140_vm1, %v139_v21, 0  ;;  %v179_v5 = vshrl.u32 %v673_v41, 16 }
  0xa1   :  { %v142_v27 = vshrl.u32 %v141_v24, 5  ;;  %v143_v28 = vand.u32 31, %v141_v24  ;;  %v476_v29 = vadd.s32 4294967169, %v287_v26  ;;  %v291_v60 = vor.u32 8388608, %v290_v42 }
  0xa3   :  { %v144_v30 = vsub.s32 32, %v143_v28  ;;  %v146_v32 = vshll.u32 %v615_v31, %v143_v28  ;;  %v149_v34 = vshll.u32 %v616_v33, %v143_v28  ;;  %v152_v36 = vshll.u32 %v617_v35, %v143_v28 }
  0xa4   :  { %v155_v38 = vshll.u32 %v618_v37, %v143_v28  ;;  %v158_v40 = vshll.u32 %v619_v39, %v143_v28  ;;  %vm161_vm2 = vcmp.lt.s32.totalorder %v142_v27, 1  ;;  %vm164_vm3 = vcmp.lt.s32.totalorder %v142_v27, 4 }
  0xa5   :  { %v147_v43 = vshrl.u32 %v616_v33, %v144_v30  ;;  %v150_v44 = vshrl.u32 %v617_v35, %v144_v30  ;;  %v153_v45 = vshrl.u32 %v618_v37, %v144_v30  ;;  %v145_v46 = vshrl.u32 %v615_v31, %v144_v30 }
  0xa6   :  { %v156_v47 = vshrl.u32 %v619_v39, %v144_v30  ;;  %v159_v49 = vshrl.u32 %v620_v48, %v144_v30  ;;  %v293_v53 = vadd.s32 1, %v476_v29  ;;  %vm163_vm4 = vcmp.lt.s32.totalorder %v142_v27, 3 }
  0xa7   :  { %v148_v50 = vor.u32 %v147_v43, %v146_v32  ;;  %v151_v51 = vor.u32 %v150_v44, %v149_v34  ;;  %v154_v52 = vor.u32 %v153_v45, %v152_v36  ;;  %vm162_vm5 = vcmp.lt.s32.totalorder %v142_v27, 2 }
  0xa8   :  { %v157_v54 = vor.u32 %v156_v47, %v155_v38  ;;  %v160_v55 = vor.u32 %v159_v49, %v158_v40  ;;  %vm294_vm6 = vcmp.gt.s32.totalorder %v293_v53, 0  ;;  %v693_v14 = vshll.u32 %v291_v60, 8 }
  0xa9   :  { %v166_v57 = vsel %vm164_vm3, %v154_v52, 2102212464  ;;  %v169_v58 = vsel %vm161_vm2, %v148_v50, %v151_v51  ;;  %v173_v59 = vsel %vm161_vm2, %v151_v51, %v154_v52  ;;  %v165_v63 = vsel %vm161_vm2, %v145_v46, %v148_v50 }
  0xaa   :  { %v170_v61 = vsel %vm164_vm3, %v157_v54, 920167782  ;;  %v174_v62 = vsel %vm164_vm3, %v160_v55, 1326507024  ;;  %v167_v0 = vsel %vm163_vm4, %v151_v51, %v166_v57  ;;  %v295_v6 = vsel %vm294_vm6, %v293_v53, 0 }
  0xab   :  { %v171_v1 = vsel %vm163_vm4, %v154_v52, %v170_v61  ;;  %v175_v2 = vsel %vm163_vm4, %v157_v54, %v174_v62  ;;  %v691_v12 = vsel %vm162_vm5, %v165_v63, %v167_v0  ;;  %v695_v18 = vshrl.u32 %v295_v6, 5 }
  0xac   :  { %v172_v3 = vsel %vm162_vm5, %v169_v58, %v171_v1  ;;  %v176_v4 = vsel %vm162_vm5, %v173_v59, %v175_v2  ;;  %v297_v20 = vand.u32 31, %v295_v6  ;;  %v621_v43 = vmov 0  }
  0xad   :  { %v180_v7 = vand.u32 65535, %v176_v4  ;;  %v181_v8 = vshrl.u32 %v176_v4, 16  ;;  %v202_v9 = vand.u32 65535, %v172_v3  ;;  %v203_v11 = vshrl.u32 %v172_v3, 16 }
  0xae   :  { %v697_v42 = vsub.s32 32, %v297_v20  ;;  %v300_v50 = vshll.u32 %v615_v31, %v297_v20  ;;  %v303_v53 = vshll.u32 %v616_v33, %v297_v20  ;;  %v306_v59 = vshll.u32 %v617_v35, %v297_v20 }
  0xaf   :  { %v183_v16 = vmul.u32 %v181_v8, %v178_v56  ;;  %v184_v17 = vmul.u32 %v180_v7, %v179_v5  ;;  %v182_v21 = vmul.u32 %v180_v7, %v178_v56  ;;  %v185_v22 = vmul.u32 %v181_v8, %v179_v5 }
  0xb0   :  { %v205_v23 = vmul.u32 %v203_v11, %v178_v56  ;;  %v206_v24 = vmul.u32 %v202_v9, %v179_v5  ;;  %v204_v29 = vmul.u32 %v202_v9, %v178_v56  ;;  %v207_v30 = vmul.u32 %v203_v11, %v179_v5 }
  0xb1   :  { %v186_v26 = vshll.u32 %v183_v16, 16  ;;  %v187_v28 = vshrl.u32 %v183_v16, 16  ;;  %v188_v32 = vshll.u32 %v184_v17, 16  ;;  %v189_v34 = vshrl.u32 %v184_v17, 16 }
  0xb2   :  { %v208_v27 = vshll.u32 %v205_v23, 16  ;;  %v209_v36 = vshrl.u32 %v205_v23, 16  ;;  %v210_v40 = vshll.u32 %v206_v24, 16  ;;  %v211_v45 = vshrl.u32 %v206_v24, 16 }
  0xb3   :  { %vm190_vm7 = vc.u32 %v182_v21, %v186_v26  ;;  %v192_v38 = vadd.s32 %v186_v26, %v182_v21  ;;  %v301_v56 = vshrl.u32 %v616_v33, %v697_v42  ;;  %v304_v57 = vshrl.u32 %v617_v35, %v697_v42 }
  0xb4   :  { %v191_v44 = vsel %vm190_vm7, 1, %v621_v43  ;;  %vm212_vm8 = vc.u32 %v204_v29, %v208_v27  ;;  %v214_v46 = vadd.s32 %v208_v27, %v204_v29  ;;  %v307_v60 = vshrl.u32 %v618_v37, %v697_v42 }
  0xb5   :  { %v193_v47 = vadd.s32 %v191_v44, %v185_v22  ;;  %vm194_vm9 = vc.u32 %v192_v38, %v188_v32  ;;  %v213_v49 = vsel %vm212_vm8, 1, %v621_v43  ;;  %v309_v61 = vshll.u32 %v618_v37, %v297_v20 }
  0xb6   :  { %v195_v51 = vsel %vm194_vm9, 1, %v621_v43  ;;  %v215_v52 = vadd.s32 %v213_v49, %v207_v30  ;;  %vm216_vm10 = vc.u32 %v214_v46, %v210_v40  ;;  %v713_v63 = vor.u32 %v301_v56, %v300_v50 }
  0xb7   :  { %v197_v54 = vadd.s32 %v195_v51, %v193_v47  ;;  %v217_v55 = vsel %vm216_vm10, 1, %v621_v43  ;;  %v715_v0 = vor.u32 %v304_v57, %v303_v53  ;;  %v310_v1 = vshrl.u32 %v619_v39, %v697_v42 }
  0xb8   :  { %v219_v58 = vadd.s32 %v217_v55, %v215_v52  ;;  %v308_v2 = vor.u32 %v307_v60, %v306_v59  ;;  %v312_v3 = vshll.u32 %v619_v39, %v297_v20  ;;  %v313_v35 = vshrl.u32 %v620_v48, %v697_v42 }
  0xb9   :  { %v198_v62 = vadd.s32 %v197_v54, %v187_v28  ;;  %v724_v5 = vadd.s32 %v214_v46, %v210_v40  ;;  %v311_v37 = vor.u32 %v310_v1, %v309_v61  ;;  %vm315_vm11 = vcmp.lt.s32.totalorder %v695_v18, 1 }
  0xba   :  { %v220_v33 = vadd.s32 %v219_v58, %v209_v36  ;;  %v314_v7 = vor.u32 %v313_v35, %v312_v3  ;;  %vm318_vm12 = vcmp.lt.s32.totalorder %v695_v18, 4  ;;  %v323_v8 = vsel %vm315_vm11, %v713_v63, %v715_v0 }
  0xbb   :  { %v722_v4 = vadd.s32 %v198_v62, %v189_v34  ;;  %vm317_vm14 = vcmp.lt.s32.totalorder %v695_v18, 3  ;;  %v324_v39 = vsel %vm318_vm12, %v311_v37, 920167782  ;;  %vm316_vm15 = vcmp.lt.s32.totalorder %v695_v18, 2 }
  0xbc   :  { %v221_v6 = vadd.s32 %v220_v33, %v211_v45  ;;  %v325_v9 = vsel %vm317_vm14, %v308_v2, %v324_v39  ;;  %v327_v11 = vsel %vm315_vm11, %v715_v0, %v308_v2  ;;  %v222_v16 = vmul.u32 %v673_v41, %v691_v12 }
  0xbd   :  { %vm224_vm13 = vc.u32 %v722_v4, %v724_v5  ;;  %v326_v17 = vsel %vm316_vm15, %v323_v8, %v325_v9  ;;  %v328_v20 = vsel %vm318_vm12, %v314_v7, 1326507024  ;;  %v332_v21 = vand.u32 65535, %v693_v14 }
  0xbe   :  { %v225_v48 = vadd.s32 1, %v221_v6  ;;  %v329_v23 = vsel %vm317_vm14, %v311_v37, %v328_v20  ;;  %v356_v24 = vand.u32 65535, %v326_v17  ;;  %v357_v26 = vshrl.u32 %v326_v17, 16 }
  0xbf   :  { %v330_v29 = vsel %vm316_vm15, %v327_v11, %v329_v23  ;;  %v333_v41 = vshrl.u32 %v693_v14, 16  ;;  %v299_v60 = vshrl.u32 %v615_v31, %v697_v42  ;;  %v320_v1 = vsel %vm318_vm12, %v308_v2, 2102212464 }
  0xc0   :  { %v226_v22 = vsel %vm224_vm13, %v225_v48, %v221_v6  ;;  %v334_v12 = vand.u32 65535, %v330_v29  ;;  %v335_v30 = vshrl.u32 %v330_v29, 16  ;;  %v359_v32 = vmul.u32 %v357_v26, %v332_v21 }
  0xc1   :  { %v227_v28 = vadd.s32 %v226_v22, %v222_v16  ;;  %v360_v27 = vmul.u32 %v356_v24, %v333_v41  ;;  %v358_v44 = vmul.u32 %v356_v24, %v332_v21  ;;  %v361_v50 = vmul.u32 %v357_v26, %v333_v41 }
  0xc2   :  { %v337_v36 = vmul.u32 %v335_v30, %v332_v21  ;;  %v338_v38 = vmul.u32 %v334_v12, %v333_v41  ;;  %v362_v45 = vshll.u32 %v359_v32, 16  ;;  %v336_v46 = vmul.u32 %v334_v12, %v332_v21 }
  0xc3   :  { %v228_v34 = vadd.s32 536870912, %v227_v28  ;;  %v339_v47 = vmul.u32 %v335_v30, %v333_v41  ;;  %v364_v53 = vshll.u32 %v360_v27, 16  ;;  %v319_v7 = vsel %vm315_vm11, %v299_v60, %v713_v63 }
  0xc4   :  { %v340_v49 = vshll.u32 %v337_v36, 16  ;;  %v342_v52 = vshll.u32 %v338_v38, 16  ;;  %vm366_vm0 = vc.u32 %v358_v44, %v362_v45  ;;  %v368_v56 = vadd.s32 %v362_v45, %v358_v44 }
  0xc5   :  { %v755_v40 = vshrl.u32 %v228_v34, 30  ;;  %v367_v55 = vsel %vm366_vm0, 1, %v621_v43  ;;  %v341_v3 = vshrl.u32 %v337_v36, 16  ;;  %v363_v31 = vshrl.u32 %v359_v32, 16 }
  0xc6   :  { %vm344_vm1 = vc.u32 %v336_v46, %v340_v49  ;;  %v346_v54 = vadd.s32 %v340_v49, %v336_v46  ;;  %v369_v59 = vadd.s32 %v367_v55, %v361_v50  ;;  %vm370_vm3 = vc.u32 %v368_v56, %v364_v53  ;;  %v123_v49 = vpop.f32.mrf.mxu1 }
  0xc7   :  { %v230_v51 = vshll.u32 %v755_v40, 30  ;;  %v345_v58 = vsel %vm344_vm1, 1, %v621_v43  ;;  %v371_v37 = vsel %vm370_vm3, 1, %v621_v43  ;;  %v321_v39 = vsel %vm317_vm14, %v715_v0, %v320_v1 }
  0xc8   :  { %v347_v61 = vadd.s32 %v345_v58, %v339_v47  ;;  %vm348_vm2 = vc.u32 %v346_v54, %v342_v52  ;;  %v373_v42 = vadd.s32 %v371_v37, %v369_v59  ;;  %v343_v48 = vshrl.u32 %v338_v38, 16 }
  0xc9   :  { %v231_v57 = vsub.s32 %v227_v28, %v230_v51  ;;  %v349_v33 = vsel %vm348_vm2, 1, %v621_v43  ;;  %v365_v9 = vshrl.u32 %v360_v27, 16  ;;  %v372_v20 = vadd.s32 %v368_v56, %v364_v53 }
  0xca   :  { %v351_v35 = vadd.s32 %v349_v33, %v347_v61  ;;  %v374_v11 = vadd.s32 %v373_v42, %v363_v31  ;;  %v322_v43 = vsel %vm316_vm15, %v319_v7, %v321_v39  ;;  %v223_v23 = vadd.s32 %v724_v5, %v722_v4 }
  0xcb   :  { %vm232_vm4 = vcmp.lt.s32.totalorder %v231_v57, 0  ;;  %v233_v62 = vsub.s32 0, %v231_v57  ;;  %v376_v26 = vmul.u32 %v693_v14, %v322_v43  ;;  %vm131_vm8 = vcmp.lt.s32.totalorder %v658_v13, 0 }
  0xcc   :  { %v352_v2 = vadd.s32 %v351_v35, %v341_v3  ;;  %v375_v21 = vadd.s32 %v374_v11, %v365_v9  ;;  %v73_v47 = vperm.slane %v655_v10, 1  ;;  %vm784_vm9 = vcmp.le.f32.partialorder %v129_v15, 0.7853982 }
  0xcd   :  { %v234_v6 = vsel %vm232_vm4, %v233_v62, %v231_v57  ;;  %v253_v15 = vsub.s32 4, %v755_v40  ;;  %vm285_vm13 = vcmp.lt.s32.totalorder %v662_v19, 0  ;;  %vm802_vm15 = vcmp.le.f32.partialorder %v283_v25, 0.7853982 }
  0xce   :  { %v235_v8 = vclz %v234_v6  ;;  %v353_v17 = vadd.s32 %v352_v2, %v343_v48  ;;  %v379_v22 = vadd.s32 1, %v375_v21  ;;  %v124_v55 = vadd.f32 %v123_v49, %v73_v47 }
  0xcf   :  { %v254_v7 = vsel %vm131_vm8, %v253_v15, %v755_v40  ;;  %vm272_vm0 = vweird.f32 %v658_v13  ;;  %vm426_vm4 = vweird.f32 %v662_v19 }
  0xd0   :  { %v474_v16 = vadd.s32 4294967294, %v235_v8  ;;  %vm378_vm6 = vc.u32 %v353_v17, %v372_v20  ;;  %v437_v10 = vmul.f32 %v124_v55, %v124_v55  ;;  %v377_v33 = vadd.s32 %v372_v20, %v353_v17 }
  0xd1   :  { %v380_v28 = vsel %vm378_vm6, %v379_v22, %v375_v21 }
  0xd2   :  { %vm475_vm5 = vcmp.lt.s32.totalorder %v474_v16, 0  ;;  %v381_v30 = vadd.s32 %v380_v28, %v376_v26  ;;  %v439_v62 = vsub.f32 0.0, %v437_v10 }
  0xd3   :  { %v238_v63 = vsel %vm475_vm5, 0, %v474_v16  ;;  %v256_v16 = vsel %vm784_vm9, 0, %v254_v7 }
  0xd4   :  { %v239_v24 = vsub.s32 32, %v238_v63  ;;  %v243_v0 = vsub.s32 4294967266, %v238_v63  ;;  %v240_v29 = vshll.u32 %v231_v57, %v238_v63  ;;  %v382_v34 = vadd.s32 536870912, %v381_v30 }
  0xd5   :  { %v441_v48 = vmul.f32 1.442695, %v439_v62  ;;  %v273_v22 = vand.u32 3, %v256_v16 }
  0xd6   :  { %v241_v41 = vshrl.u32 %v223_v23, %v239_v24  ;;  %v244_v12 = vadd.s32 127, %v243_v0  ;;  %v777_v36 = vshrl.u32 %v382_v34, 30  ;;  %v126_v0 = vpop.f32.mrf.mxu3 }
  0xd7   :  { %502 = vpow2.f32 %v441_v48  ;;  %vm275_vm11 = vcmp.eq.s32.totalorder %v273_v22, 0  ;;  %vm278_vm12 = vcmp.eq.s32.totalorder %v273_v22, 2  ;;  %vm274_vm14 = vcmp.lt.s32.totalorder %v273_v22, 2 }
  0xd8   :  { %v242_v32 = vor.u32 %v241_v41, %v240_v29  ;;  %v245_v18 = vshll.u32 %v244_v12, 23  ;;  %v384_v45 = vshll.u32 %v777_v36, 30  ;;  %v127_v12 = vadd.f32 %v126_v0, %v73_v47 }
  0xd9   :  { %v407_v25 = vsub.s32 4, %v777_v36 }
  0xda   :  { %v246_v27 = vor.u32 4788187, %v245_v18  ;;  %v249_v44 = vcvt.s32.f32 %v242_v32  ;;  %v385_v5 = vsub.s32 %v381_v30, %v384_v45 }
  0xdc   :  { %v247_v38 = vand.u32 2147483647, %v246_v27  ;;  %vm386_vm7 = vcmp.lt.s32.totalorder %v385_v5, 0  ;;  %v387_v14 = vsub.s32 0, %v385_v5 }
  0xdd   :  { %v503_v30 = vpop.eup %502 }
  0xde   :  { %v250_v4 = vmul.f32 %v249_v44, %v247_v38  ;;  %v388_v52 = vsel %vm386_vm7, %v387_v14, %v385_v5 }
  0xdf   :  { %v389_v54 = vclz %v388_v52 }
  0xe0   :  { %v251_v46 = vxor.u32 2147483648, %v250_v4 }
  0xe1   :  { %v477_v57 = vadd.s32 4294967294, %v389_v54 }
  0xe2   :  { %v252_v51 = vsel %vm131_vm8, %v251_v46, %v250_v4 }
  0xe3   :  { %v255_v53 = vsel %vm784_vm9, %v658_v13, %v252_v51  ;;  %vm478_vm10 = vcmp.lt.s32.totalorder %v477_v57, 0  ;;  %v408_v13 = vsel %vm285_vm13, %v407_v25, %v777_v36 }
  0xe4   :  { %v257_v56 = vmul.f32 %v255_v53, %v255_v53  ;;  %v392_v61 = vsel %vm478_vm10, 0, %v477_v57  ;;  %v410_v57 = vsel %vm802_vm15, 0, %v408_v13 }
  0xe5   :  { %v393_v3 = vsub.s32 32, %v392_v61  ;;  %v397_v35 = vsub.s32 4294967266, %v392_v61  ;;  %v394_v31 = vshll.u32 %v385_v5, %v392_v61  ;;  %v438_v5 = vmul.f32 %v127_v12, %v127_v12 }
  0xe6   :  { %v265_v58 = vmul.f32 -0.00019511016, %v257_v56  ;;  %v258_v59 = vmul.f32 -0.001358992, %v257_v56 }
  0xe7   :  { %v395_v42 = vshrl.u32 %v377_v33, %v393_v3  ;;  %v398_v8 = vadd.s32 127, %v397_v35  ;;  %v440_v50 = vsub.f32 0.0, %v438_v5 }
  0xe8   :  { %v266_v60 = vadd.f32 0.008332121, %v265_v58  ;;  %v259_v1 = vadd.f32 0.041655596, %v258_v59 }
  0xe9   :  { %v396_v9 = vor.u32 %v395_v42, %v394_v31  ;;  %v399_v11 = vshll.u32 %v398_v8, 23  ;;  %v443_v55 = vmul.f32 1.442695, %v440_v50 }
  0xea   :  { %v267_v37 = vmul.f32 %v266_v60, %v257_v56  ;;  %v260_v6 = vmul.f32 %v259_v1, %v257_v56  ;;  %v427_v60 = vand.u32 3, %v410_v57 }
  0xeb   :  { %v400_v43 = vor.u32 4788187, %v399_v11  ;;  %v403_v40 = vcvt.s32.f32 %v396_v9  ;;  %504 = vpow2.f32 %v443_v55 }
  0xec   :  { %v268_v39 = vadd.f32 -0.16666654, %v267_v37  ;;  %v261_v2 = vadd.f32 -0.4999988, %v260_v6  ;;  %vm429_vm1 = vcmp.eq.s32.totalorder %v427_v60, 0  ;;  %vm432_vm2 = vcmp.eq.s32.totalorder %v427_v60, 2 }
  0xed   :  { %v401_v23 = vand.u32 2147483647, %v400_v43  ;;  %vm428_vm3 = vcmp.lt.s32.totalorder %v427_v60, 2 }
  0xee   :  { %v269_v17 = vmul.f32 %v268_v39, %v257_v56  ;;  %v262_v20 = vmul.f32 %v261_v2, %v257_v56 }
  0xef   :  { %v404_v28 = vmul.f32 %v403_v40, %v401_v23 }
  0xf0   :  { %v270_v21 = vadd.f32 1.0, %v269_v17  ;;  %v263_v63 = vadd.f32 1.0, %v262_v20 }
  0xf1   :  { %v405_v41 = vxor.u32 2147483648, %v404_v28  ;;  %v505_v33 = vpop.eup %504 }
  0xf2   :  { %v271_v24 = vmul.f32 %v270_v21, %v255_v53  ;;  %v279_v26 = vxor.u32 2147483648, %v263_v63 }
  0xf3   :  { %v406_v27 = vsel %vm285_vm13, %v405_v41, %v404_v28 }
  0xf4   :  { %v276_v29 = vxor.u32 2147483648, %v271_v24  ;;  %v280_v18 = vsel %vm278_vm12, %v279_v26, %v271_v24  ;;  %v409_v44 = vsel %vm802_vm15, %v662_v19, %v406_v27 }
  0xf5   :  { %v411_v4 = vmul.f32 %v409_v44, %v409_v44 }
  0xf6   :  { %v277_v32 = vsel %vm275_vm11, %v263_v63, %v276_v29 }
  0xf7   :  { %v281_v38 = vsel %vm274_vm14, %v277_v32, %v280_v18  ;;  %v419_v14 = vmul.f32 -0.00019511016, %v411_v4  ;;  %v412_v47 = vmul.f32 -0.001358992, %v411_v4 }
  0xf8   :  { %v282_v45 = vsel %vm272_vm0, nan, %v281_v38 }
  0xf9   :  { %v445_v46 = vmul.f32 %v503_v30, %v282_v45  ;;  %v420_v49 = vadd.f32 0.008332121, %v419_v14  ;;  %v413_v51 = vadd.f32 0.041655596, %v412_v47 }
  0xfb   :  { %447 = vst [vmem:[#allocation8] sm:$0xff] %v445_v46  ;;  %v421_v52 = vmul.f32 %v420_v49, %v411_v4  ;;  %v414_v53 = vmul.f32 %v413_v51, %v411_v4 }
  0xfd   :  { %v422_v54 = vadd.f32 -0.16666654, %v421_v52  ;;  %v415_v56 = vadd.f32 -0.4999988, %v414_v53 }
  0xff   :  { %v423_v10 = vmul.f32 %v422_v54, %v411_v4  ;;  %v416_v58 = vmul.f32 %v415_v56, %v411_v4 }
 0x101   :  { %v424_v59 = vadd.f32 1.0, %v423_v10  ;;  %v417_v15 = vadd.f32 1.0, %v416_v58 }
 0x103   :  { %v425_v61 = vmul.f32 %v424_v59, %v409_v44  ;;  %v433_v62 = vxor.u32 2147483648, %v417_v15 }
 0x105   :  { %v430_v1 = vxor.u32 2147483648, %v425_v61  ;;  %v434_v3 = vsel %vm432_vm2, %v433_v62, %v425_v61 }
 0x107   :  { %v431_v36 = vsel %vm429_vm1, %v417_v15, %v430_v1 }
 0x108   :  { %v435_v35 = vsel %vm428_vm3, %v431_v36, %v434_v3 }
 0x109   :  { %v436_v37 = vsel %vm426_vm4, nan, %v435_v35 }
 0x10a   :  { %v446_v6 = vmul.f32 %v505_v33, %v436_v37 }
 0x10c   :  { %448 = vst [vmem:[#allocation8 + $0x8] sm:$0xff] %v446_v6 }
 0x10d   :  { %461 = dma.vmem_to_hbm [thread:$0]  %s454_s29, 256, %s456_s5, [#allocation4], %s612_s24, %s612_s24, %s613_s25  }
 0x10e   :  { %606 = dma.done.wait [#allocation4], 256  }
 0x10f   :  { %607 = vsyncadd [#allocation4], 4294967040 }
 0x110   :  { %466 = vsyncpa [#allocation3], 1 }
 0x111   :  { %467 = vsyncpa [#allocation6], 1 }
 0x112   :  { %468 = vsyncpa [#allocation4], 1 }

</bundles_post_ra>
